<compile_context>
chip_gen: v7x
topology: tpu7x:2x2x1
jax: 0.10.0
libtpu: 0.0.40
codegen_flags: <defaults>
</compile_context>

<pallas_src>
import jax
import jax.numpy as jnp
from jax import lax
from jax.experimental import pallas as pl
from jax.experimental.pallas import tpu as pltpu

_LANES = 128
_MiB = 1024 * 1024


def _vmem_capacity_bytes() -> int:
    """Physical VMEM of the current TPU generation (conservative fallback)."""
    try:
        cap = getattr(pltpu.get_tpu_info(), "vmem_capacity_bytes", None)
        if cap:
            return int(cap)
    except Exception:
        pass
    return 64 * _MiB  # v7x-sized conservative default


def _plan(rows: int, itemsize: int, n_streams: int):
    """Pick (block_rows, vmem_limit_bytes) for a (rows, 128) streaming op.

    n_streams = number of big arrays streamed through VMEM (in + out),
    each double-buffered by the Pallas pipeline.
    """
    vmem_budget = min((_vmem_capacity_bytes() * 3) // 4, 64 * _MiB)
    # per-operand block size: double-buffered per stream + ~8 MiB slack
    block_bytes = min(8 * _MiB, max(_MiB, (vmem_budget - 8 * _MiB) // (2 * n_streams)))
    sublane_mult = max(8, 32 // itemsize)          # 8 f32 / 16 bf16 / 32 int8
    block_rows = max(
        sublane_mult,
        (block_bytes // (_LANES * itemsize)) // sublane_mult * sublane_mult,
    )
    if block_rows >= rows:
        if rows >= 2 * sublane_mult:
            # Force >=2 grid blocks so both v7x TensorCores get work.
            half = -(-rows // 2)
            block_rows = max(sublane_mult, -(-half // sublane_mult) * sublane_mult)
        else:
            block_rows = rows                      # single full-array block
    return block_rows, vmem_budget


# --------------------------- forward kernel ---------------------------------
def _rezero_fwd_kernel(scalar_ref, x_ref, o_ref):
    # scalar_ref: (1, 1) f32 in SMEM; x_ref / o_ref: (block_rows, 128) VMEM.
    s = scalar_ref[0, 0].astype(o_ref.dtype)       # native-dtype VPU multiply
    o_ref[...] = x_ref[...] * s


def _rezero_impl(x: jax.Array, scalar, *, donate: bool = False) -> jax.Array:
    """scalar * x, elementwise, via a Pallas TPU kernel."""
    orig_shape = x.shape

    # torch-style promotion: float scalar * int tensor -> float tensor.
    if not jnp.issubdtype(x.dtype, jnp.floating):
        x = x.astype(jnp.float32)
    out_dtype = x.dtype

    s32 = jnp.asarray(scalar, dtype=jnp.float32).reshape(1, 1)

    n = x.size
    if n == 0:
        return x.reshape(orig_shape)

    if n % _LANES != 0:
        # Sub-lane-multiple remainder: fused XLA multiply is already at the
        # 2N-byte roofline; any kernel + stitch path would only add traffic.
        return x * s32[0, 0].astype(out_dtype)

    rows = n // _LANES
    itemsize = jnp.dtype(out_dtype).itemsize
    block_rows, vmem_limit = _plan(rows, itemsize, n_streams=2)

    x2d = x.reshape(rows, _LANES)                  # contiguous reshape: free
    grid = (pl.cdiv(rows, block_rows),)            # ragged last block -> masked

    out2d = pl.pallas_call(
        _rezero_fwd_kernel,
        out_shape=jax.ShapeDtypeStruct((rows, _LANES), out_dtype),
        grid_spec=pltpu.PrefetchScalarGridSpec(
            num_scalar_prefetch=0,
            grid=grid,
            in_specs=[
                pl.BlockSpec((1, 1), lambda i: (0, 0), memory_space=pltpu.SMEM),
                pl.BlockSpec((block_rows, _LANES), lambda i: (i, 0)),
            ],
            out_specs=pl.BlockSpec((block_rows, _LANES), lambda i: (i, 0)),
        ),
        compiler_params=pltpu.CompilerParams(
            dimension_semantics=("parallel",),
            vmem_limit_bytes=vmem_limit,
        ),
        # donate=True lets XLA reuse x's HBM buffer for the output.
        input_output_aliases=({1: 0} if donate else {}),
    )(s32, x2d)
    return out2d.reshape(orig_shape)


# --------------------------- fused backward kernel --------------------------
def _make_bwd_kernel(block_rows: int, total_rows: int):
    needs_mask = (total_rows % block_rows) != 0

    def kernel(scalar_ref, x_ref, g_ref, dx_ref, dsum_ref):
        i = pl.program_id(0)

        @pl.when(i == 0)
        def _():
            dsum_ref[...] = jnp.zeros_like(dsum_ref)

        s = scalar_ref[0, 0]
        g32 = g_ref[...].astype(jnp.float32)
        x32 = x_ref[...].astype(jnp.float32)

        dx_ref[...] = (s * g32).astype(dx_ref.dtype)

        prod = x32 * g32
        if needs_mask:
            # Ragged last block: zero the out-of-bounds rows before reducing.
            row_ids = lax.broadcasted_iota(jnp.int32, (block_rows, _LANES), 0)
            valid = total_rows - i * block_rows
            prod = jnp.where(row_ids < valid, prod, 0.0)
        dsum_ref[...] += jnp.sum(prod, keepdims=True)

    return kernel


def _rezero_bwd_impl(x, g, scalar):
    """Fused backward: dx = s * g (written once) and dscalar = sum(x * g)."""
    xc = x if jnp.issubdtype(x.dtype, jnp.floating) else x.astype(jnp.float32)
    gx = g if jnp.issubdtype(g.dtype, jnp.floating) else g.astype(jnp.float32)
    dx_dtype = xc.dtype
    s32 = jnp.asarray(scalar, dtype=jnp.float32).reshape(1, 1)

    n = xc.size
    if n == 0:
        return jnp.zeros(x.shape, dx_dtype), jnp.zeros((), jnp.float32)

    if n % _LANES != 0:
        g32 = gx.astype(jnp.float32)
        dx = (s32[0, 0] * g32).astype(dx_dtype)
        return dx, jnp.sum(xc.astype(jnp.float32) * g32)

    rows = n // _LANES
    itemsize = max(jnp.dtype(dx_dtype).itemsize, jnp.dtype(gx.dtype).itemsize)
    block_rows, vmem_limit = _plan(rows, itemsize, n_streams=3)

    x2d = xc.reshape(rows, _LANES)
    g2d = gx.reshape(rows, _LANES)
    grid = (pl.cdiv(rows, block_rows),)

    dx2d, dsum = pl.pallas_call(
        _make_bwd_kernel(block_rows, rows),
        out_shape=(
            jax.ShapeDtypeStruct((rows, _LANES), dx_dtype),
            jax.ShapeDtypeStruct((1, 1), jnp.float32),
        ),
        grid_spec=pltpu.PrefetchScalarGridSpec(
            num_scalar_prefetch=0,
            grid=grid,
            in_specs=[
                pl.BlockSpec((1, 1), lambda i: (0, 0), memory_space=pltpu.SMEM),
                pl.BlockSpec((block_rows, _LANES), lambda i: (i, 0)),
                pl.BlockSpec((block_rows, _LANES), lambda i: (i, 0)),
            ],
            out_specs=(
                pl.BlockSpec((block_rows, _LANES), lambda i: (i, 0)),
                pl.BlockSpec((1, 1), lambda i: (0, 0)),   # resident accumulator
            ),
        ),
        compiler_params=pltpu.CompilerParams(
            dimension_semantics=("arbitrary",),           # accumulator axis
            vmem_limit_bytes=vmem_limit,
        ),
    )(s32, x2d, g2d)
    return dx2d.reshape(x.shape), dsum[0, 0]


# --------------------------- custom VJP --------------------------------------
@jax.custom_vjp
def rezero_forward(x: jax.Array, scalar) -> jax.Array:
    return _rezero_impl(x, scalar)


def _rezero_fwd(x, scalar):
    return _rezero_impl(x, scalar), (x, scalar)


def _rezero_bwd(res, g):
    x, scalar = res
    # TODO(synk): gradients w.r.t. integer inputs are returned as float32
    # (semantically questionable; torch would not differentiate them either).
    dx, dsum = _rezero_bwd_impl(x, g, scalar)
    dscalar = dsum.astype(jnp.result_type(scalar)).reshape(jnp.shape(scalar))
    return dx, dscalar


rezero_forward.defvjp(_rezero_fwd, _rezero_bwd)


class ReZeroCellPallas:
    """JAX/Pallas port of ReZeroCell: forward(x) = scalar * x."""

    def __init__(self, scalar=None, learnable: bool = True):
        self.learnable = learnable
        init = 0.0 if scalar is None else scalar
        self.scalar = jnp.asarray(init, dtype=jnp.float32)

    def __call__(self, x: jax.Array) -> jax.Array:
        return rezero_forward(x, self.scalar)


if __name__ == "__main__":
    key = jax.random.PRNGKey(0)
    k1, k2, k3, k4 = jax.random.split(key, 4)

    # 1) Module-shaped input, default init (scalar = 0) -> exactly zeros.
    x = jax.random.normal(k1, (2, 4, 16, 16), dtype=jnp.float32)
    cell_zero = ReZeroCellPallas()
    y_zero = jax.block_until_ready(cell_zero(x))
    assert y_zero.shape == x.shape and y_zero.dtype == x.dtype
    assert jnp.all(y_zero == 0.0)

    # 2) Non-trivial scalar, f32, lane-aligned (kernel path, 2 grid blocks).
    cell = ReZeroCellPallas(scalar=0.73)
    y = jax.block_until_ready(cell(x))
    assert jnp.allclose(y, 0.73 * x, atol=1e-6, rtol=1e-6)

    # 3) bf16 input: native bf16 multiply inside the kernel.
    xb = jax.random.normal(k2, (4, 64, 128), dtype=jnp.bfloat16)
    yb = jax.block_until_ready(cell(xb))
    refb = (jnp.float32(0.73) * xb.astype(jnp.float32)).astype(jnp.bfloat16)
    assert yb.dtype == jnp.bfloat16
    assert jnp.allclose(yb.astype(jnp.float32), refb.astype(jnp.float32),
                        atol=1e-2, rtol=1e-2)

    # 4a) Ragged row count (n % 128 == 0, rows % block_rows != 0): masked
    #     last grid block inside the kernel, no concatenate / rewrite.
    xm = jax.random.normal(k3, (3, 7, 128), dtype=jnp.float32)
    ym = jax.block_until_ready(cell(xm))
    assert jnp.allclose(ym, 0.73 * xm, atol=1e-6, rtol=1e-6)

    # 4b) Sub-lane remainder (n % 128 != 0): roofline XLA fallback path.
    xr = jax.random.normal(k4, (7, 9, 23), dtype=jnp.float32)   # 1449 elems
    yr = jax.block_until_ready(cell(xr))
    assert jnp.allclose(yr, 0.73 * xr, atol=1e-6, rtol=1e-6)

    # 5) Fused backward kernel: grads w.r.t. the scalar and x.
    loss = lambda s, xx: jnp.sum(rezero_forward(xx, s))
    ds = jax.block_until_ready(jax.grad(loss, argnums=0)(jnp.float32(0.73), x))
    assert jnp.allclose(ds, jnp.sum(x), atol=1e-3, rtol=1e-3)
    dx = jax.block_until_ready(jax.grad(loss, argnums=1)(jnp.float32(0.73), x))
    assert jnp.allclose(dx, jnp.full_like(x, 0.73), atol=1e-6, rtol=1e-6)

    print("KERNEL_OK")
</pallas_src>

<mosaic_0001>
module attributes {stable_mosaic.version = 11 : i64} {
  func.func @_rezero_fwd_kernel(%arg0: i32, %arg1: memref<1x1xf32, #tpu.memory_space<smem>>, %arg2: memref<8x128xf32, #tpu.memory_space<vmem>>, %arg3: memref<8x128xf32, #tpu.memory_space<vmem>>) attributes {dimension_semantics = [#tpu.dimension_semantics<parallel>], iteration_bounds = array<i64: 2>, scalar_prefetch = 0 : i64, scratch_operands = 0 : i64, tpu.core_type = #tpu.core_type<tc>, window_params = [{transform_indices = @transform_0, window_bounds = array<i64: 1, 1>}, {transform_indices = @transform_1, window_bounds = array<i64: 8, 128>}, {transform_indices = @transform_2, window_bounds = array<i64: 8, 128>}]} {
    %c0 = arith.constant 0 : index
    %c0_0 = arith.constant 0 : index
    %0 = memref.load %arg1[%c0, %c0_0] : memref<1x1xf32, #tpu.memory_space<smem>>
    %c0_1 = arith.constant 0 : index
    %c0_2 = arith.constant 0 : index
    %1 = vector.load %arg2[%c0_1, %c0_2] : memref<8x128xf32, #tpu.memory_space<vmem>>, vector<8x128xf32>
    %2 = vector.broadcast %0 : f32 to vector<8x128xf32>
    %3 = arith.mulf %1, %2 : vector<8x128xf32>
    %c0_3 = arith.constant 0 : index
    %c0_4 = arith.constant 0 : index
    %4 = vector.load %arg3[%c0_3, %c0_4] : memref<8x128xf32, #tpu.memory_space<vmem>>, vector<8x128xf32>
    tpu.vector_store %arg3[%c0_3, %c0_4], %3 {strides = array<i32>} : memref<8x128xf32, #tpu.memory_space<vmem>>, vector<8x128xf32>,
    return
  }
  func.func @transform_0(%arg0: i32) -> (i32, i32) {
    %c0_i32 = arith.constant 0 : i32
    %c0_i32_0 = arith.constant 0 : i32
    %c0_i32_1 = arith.constant 0 : i32
    return %c0_i32, %c0_i32_0 : i32, i32
  }
  func.func @transform_1(%arg0: i32) -> (i32, i32) {
    %c0_i32 = arith.constant 0 : i32
    %c0_i32_0 = arith.constant 0 : i32
    return %arg0, %c0_i32 : i32, i32
  }
  func.func @transform_2(%arg0: i32) -> (i32, i32) {
    %c0_i32 = arith.constant 0 : i32
    %c0_i32_0 = arith.constant 0 : i32
    return %arg0, %c0_i32 : i32, i32
  }
}

</mosaic_0001>

<bundles_post_ra>
// kernel: tpu_custom_call.1
= control target key start
LH: loop header
LB: loop body
LE: loop exit
PB: predicated region body
PF: predicated region fallthrough
CT: control target
= control target key end

     0   :  { %s586_s0 = inlined_call_operand.<no memory space> [shape: f32[1,1], index: 0, kind: input, shape index: {}]   ;;  %s587_s1 = inlined_call_operand.hbm [shape: f32[16,128], index: 1, kind: input, shape index: {}]   ;;  %s588_s2 = inlined_call_operand.hbm [shape: f32[16,128], index: 2, kind: output, shape index: {}]  }
   0x1   :  { %7 = sst [smem:[#allocation2]] %s586_s0 }
   0x2   :  { %8 = vsyncpa [#allocation4], 0 }
   0x3   :  { %10 = vsyncpa [#allocation4 + $0x1], 0 }
   0x4   :  { %11 = vsyncpa [#allocation5], 0 }
   0x5   :  { %13 = vsyncpa [#allocation5 + $0x1], 0  ;;  %s425_s11 = smov 0   ;;  %s427_s12 = smov 0  }
   0x6   :  { %s429_s13 = smov 0   ;;  %s431_s14 = smov 0  }
   0x7 LB: > { %s446_s0 = sadd.s32 4294967295, %s403_s14   ;;  %s249_s15 = sadd.s32 4294967294, %s403_s14   ;;  %s403_s14 = sphi %s431_s14, %s603_s14   ;;  %s399_s13 = sphi %s429_s13, %s602_s13   ;;  %s395_s12 = sphi %s427_s12, %s601_s12   ;;  %s391_s11 = sphi %s425_s11, %s600_s11  }
   0x8   : > { %s450_s16 = sadd.s32 1, %s403_s14   ;;  %s47_s17 = sadd.s32 1, %s399_s13 }
   0x9   : > { %s44_s18 = ssub.s32 %s403_s14, %s450_s16  ;;  %p54_p0 = scmp.ne.s32.totalorder %s399_s13, %s395_s12 }
   0xa   : > { %p45_p1 = scmp.eq.s32.totalorder %s44_s18, 0  ;;  %p55_p2 = scmp.eq.s32.totalorder %s403_s14, 0 }
   0xb   : > { %p60_p3 = scmp.ne.s32.totalorder %s395_s12, %s391_s11  ;;  %p61_p4 = scmp.eq.s32.totalorder %s446_s0, 0 }
   0xc   : > { %s462_s19 = scalar_select %p45_p1, %s399_s13, %s47_s17  }
   0xd   : > { %p464_p5 = por %p55_p2, %p54_p0  ;;  %p468_p6 = por %p61_p4, %p60_p3 }
   0xe   : > { %p84_p7 = scmp.eq.s32.totalorder %s446_s0, 1  ;;  %p90_p8 = scmp.eq.s32.totalorder %s249_s15, 1 }
   0xf   : > { %p273_p10 = scmp.lt.s32.totalorder %s403_s14, 2  ;;  %s113_s24 = sand.u32 1, %s399_s13  }
  0x10   : > { %p475_p11 = por %p84_p7, %p54_p0  ;;  %p479_p12 = por %p90_p8, %p60_p3 }
  0x11   : > { %s253_s25 = sshll.u32 %s403_s14, 7  ;;  %s252_s26 = sshll.u32 %s113_s24, 3 }
  0x12   : > { %s592_s22 = scalar_select %p475_p11, 1, 0 }
  0x13   : > { %s593_s23 = scalar_select %p479_p12, 1, 0 }
  0x14   : > { %s488_s29 = scalar_lea.hbm %s587_s1, %s253_s25  ;;  %s117_s30 = scalar_lea.vmem [#allocation3], %s252_s26 }
  0x15   : > { %s124_s3 = sshll.u32 %s117_s30, 4  ;;  %p492_p13 = pnand %p273_p10, %p464_p5  ;;  %s496_s3 = int_to_ptr.vmem [resolvable:$true] %s124_s3 }
  0x16   : > { %s114_s5 = scalar_lea.sflag [#allocation4], %s113_s24  ;;  %s307_s6 = scalar_lea.hbm %s488_s29, 128 }
  0x17   : > { %p308_p2 = scmp.ne.s32.totalorder %s488_s29, %s307_s6  ;;  %p309_p3 = pneg %p492_p13 }
  0x18   : > { %s312_s9 = scalar_lea.hbm %s587_s1, 256  ;;  %p313_p5 = scmp.lt.u32.totalorder %s488_s29, %s587_s1 }
  0x19   : > { %p310_p4 = pnand %p309_p3, %p308_p2  ;;  %p314_p8 = scmp.lt.u32.totalorder %s312_s9, %s307_s6 }
  0x1a   : > { %p316_p9 = scmp.lt.u32.totalorder %s307_s6, %s488_s29 }
  0x1b   : > { %p311_p7 = pneg %p310_p4  ;;  %p315_p10 = por %p314_p8, %p313_p5 }
  0x1d   : > { %p317_p0 = por %p316_p9, %p315_p10 }
  0x1f   : > { %p318_p1 = pnand %p317_p0, %p311_p7 }
  0x21   : > { %321 = shalt.err (!%p318_p1)
}
  0x22   : > { %s322_s17 = scalar_lea.vmem %s496_s3, 128  ;;  %s405_s18 = smov [#allocation3]  }
  0x23   : > { %p323_p2 = scmp.ne.s32.totalorder %s496_s3, %s322_s17  ;;  %s327_s20 = sshll.u32 %s405_s18, 4  ;;  %s328_s20 = int_to_ptr.vmem [resolvable:$false] %s327_s20 }
  0x24   : > { %s329_s24 = scalar_lea.vmem %s328_s20, 256  ;;  %p330_p11 = scmp.lt.s32.totalorder %s496_s3, %s328_s20 }
  0x25   : > { %p325_p4 = pnand %p323_p2, %p309_p3  ;;  %p331_p5 = scmp.lt.s32.totalorder %s329_s24, %s322_s17 }
  0x27   : > { %p326_p12 = pneg %p325_p4  ;;  %p332_p8 = por %p331_p5, %p330_p11 }
  0x29   : > { %p333_p9 = pnand %p332_p8, %p326_p12 }
  0x2b   : > { %336 = shalt.err (!%p333_p9)
}
  0x2c   : > { %268 = dma.hbm_to_vmem [thread:$0]  (!%p492_p13), %s488_s29, 128, %s496_s3, %s114_s5  }
  0x2d   : > { %p595_p0 = scmp.lt.s32.totalorder %s403_s14, 3  ;;  %p596_p1 = scmp.ge.s32.totalorder %s403_s14, 1 }
  0x2f   : > { %p130_p3 = pnand %p596_p1, %p595_p0 }
  0x30   : > { %s530_s25 = sand.u32 (!%p130_p3), 1, %s395_s12  }
  0x31   : > { %133 = sbr.rel (%p130_p3) target bundleno = 83 (0x53), region = 28  ;;  %s255_s26 = sshll.u32 (!%p130_p3), %s530_s25, 3 }
  0x32   : > { %s136_s27 = scalar_lea.sflag (!%p130_p3), [#allocation4], %s530_s25  ;;  %s139_s28 = scalar_lea.vmem (!%p130_p3), [#allocation3], %s255_s26 }
  0x38   : > { %382 = dma.done.wait (%p468_p6), %s136_s27, 128  }
  0x39   : > { %384 = vsyncadd (%p468_p6), %s136_s27, 4294967168  ;;  %s160_s29 = sld [smem:[#allocation2]]  ;;  %s159_s30 = scalar_lea.vmem [#allocation6], %s255_s26  ;;  %v161_v0 = vld [vmem:[%s139_s28] sm:$0xff] }
  0x3a   : > { %s179_s3 = sshll.u32 %s159_s30, 4  ;;  %s258_s4 = sshll.u32 %s446_s0, 7  ;;  %s539_s3 = int_to_ptr.vmem [resolvable:$true] %s179_s3 }
  0x3b   : > { %s544_s21 = scalar_lea.hbm %s588_s2, %s258_s4  ;;  %s166_s7 = scalar_lea.sflag [#allocation5], %s530_s25 }
  0x3c   : > { %s337_s8 = scalar_lea.vmem %s539_s3, 128  ;;  %p597_p11 = scmp.ne.s32.totalorder %s592_s22, 0 }
  0x3d   : > { %p338_p6 = scmp.ne.s32.totalorder %s539_s3, %s337_s8  ;;  %s406_s0 = smov [#allocation6]  }
  0x3e   : > { %s341_s9 = sshll.u32 %s406_s0, 4  ;;  %s342_s9 = int_to_ptr.vmem [resolvable:$false] %s341_s9 }
  0x3f   : > { %v162_v1 = vstv %s160_s29  ;;  %p339_p12 = pnand %p338_p6, %p597_p11  ;;  %s343_s10 = scalar_lea.vmem %s342_s9, 256 }
  0x40   : > { %v163_v2 = vmul.f32 %v162_v1, %v161_v0  ;;  %p344_p7 = scmp.lt.s32.totalorder %s539_s3, %s342_s9  ;;  %p345_p10 = scmp.lt.s32.totalorder %s343_s10, %s337_s8 }
  0x41   : > { %p340_p13 = pneg %p339_p12 }
  0x42   : > { %164 = vst [vmem:[%s159_s30] sm:$0xff] %v163_v2  ;;  %p346_p2 = por %p345_p10, %p344_p7 }
  0x44   : > { %p347_p4 = pnand %p346_p2, %p340_p13 }
  0x46   : > { %350 = shalt.err (!%p347_p4)
}
  0x47   : > { %s351_s15 = scalar_lea.hbm %s544_s21, 128  ;;  %s355_s20 = scalar_lea.hbm %s588_s2, 256 }
  0x48   : > { %p352_p5 = scmp.ne.s32.totalorder %s544_s21, %s351_s15  ;;  %p356_p0 = scmp.lt.u32.totalorder %s544_s21, %s588_s2 }
  0x49   : > { %p357_p1 = scmp.lt.u32.totalorder %s355_s20, %s351_s15  ;;  %p359_p6 = scmp.lt.u32.totalorder %s351_s15, %s544_s21 }
  0x4a   : > { %p353_p8 = pnand %p352_p5, %p597_p11 }
  0x4b   : > { %p358_p3 = por %p357_p1, %p356_p0 }
  0x4c   : > { %p354_p9 = pneg %p353_p8 }
  0x4d   : > { %p360_p12 = por %p359_p6, %p358_p3 }
  0x4f   : > { %p361_p13 = pnand %p360_p12, %p354_p9 }
  0x51   : > { %364 = shalt.err (!%p361_p13)
}
  0x52   : > { %263 = dma.vmem_to_hbm [thread:$0]  (%p597_p11), %s539_s3, 128, %s544_s21, %s166_s7  }
  0x53 PF: > { %s191_s26 = sand.u32 1, %s391_s11   ;;  %p598_p7 = scmp.ne.s32.totalorder %s593_s23, 0 }
  0x54   : > { %p599_p10 = scmp.ge.s32.totalorder %s403_s14, 2  ;;  %s192_s27 = scalar_lea.sflag [#allocation5], %s191_s26 }
  0x56   : > { %p270_p2 = pnand %p599_p10, %p598_p7 }
  0x58   : > { %386 = dma.done.wait (!%p270_p2), %s192_s27, 128  }
  0x59   : > { %388 = vsyncadd (!%p270_p2), %s192_s27, 4294967168  ;;  %p16_p4 = scmp.ge.s32.totalorder %s450_s16, 4   ;;  %s600_s11 = smov %s395_s12 }
  0x5a   : > { %s601_s12 = smov %s399_s13  ;;  %s602_s13 = smov %s462_s19 }
  0x5b   : > { %s603_s14 = smov %s450_s16  ;;  %18 = sbr.rel (!%p16_p4) target bundleno = 7 (0x7), region = 73 }
  0x62   :  { %197 = vsyncpa [#allocation4], 1 }
  0x63   :  { %199 = vsyncpa [#allocation4 + $0x1], 1 }
  0x64   :  { %200 = vsyncpa [#allocation5], 1 }
  0x65   :  { %202 = vsyncpa [#allocation5 + $0x1], 1 }

</bundles_post_ra>
